<compile_context>
chip_gen: v5e
topology: v5e:2x2
jax: 0.10.0
libtpu: 0.0.40
codegen_flags: <defaults>
</compile_context>

<pallas_src>
import functools

import numpy as np
import jax
import jax.numpy as jnp
from jax import lax
from jax.experimental import pallas as pl
from jax.experimental.pallas import tpu as pltpu


# ---------------------------------------------------------------------------
# Static configuration
# ---------------------------------------------------------------------------
LANES = 128
F_IN, H1_DIM, H2_DIM = 4, 16, 32        # num_node_features, node_conv_size
L_DIM = 32                              # graph_lin_size[-1]
GC_DIM = 32                             # graph_conv_size[0]
FC_DIM = 16                             # classif_fc[0]
K_NODE = 32                             # contraction depth of the node-conv slabs
EPS_F32 = float(jnp.finfo(jnp.float32).eps)   # == torch.finfo(torch.float32).eps

# graph-level weight pack: row offsets / contraction depths (all 8-row aligned)
_OFF_L1WL, _K_L1WL = 0, 32      # LIN1 (cols 0:32) | weight_layer (cols 32:64)
_OFF_LIN2, _K_LIN2 = 32, 32
_OFF_GCG,  _K_GCG = 64, 64      # [W_rel ; W_root] for graph_conv[0]
_OFF_FC1,  _K_FC1 = 128, 32
_OFF_FC2,  _K_FC2 = 160, 16
WG_ROWS = 176

# bias rows
_B_GC1, _B_GC2, _B_L1WL, _B_LIN2, _B_GCG, _B_FC1, _B_FC2 = range(7)


# ---------------------------------------------------------------------------
# Fused Pallas kernel: the entire GraphInGraph forward
# ---------------------------------------------------------------------------
def _gig_kernel(scal_ref, a_ref, x_ref, pool_ref, wn_ref, wg_ref, b_ref,
                gx_ref, adj_ref, misc_ref, *, G, F, H1, L, eps):
    f32, bf16 = jnp.float32, jnp.bfloat16
    temp, theta = scal_ref[0], scal_ref[1]
    mu, sigma = scal_ref[2], scal_ref[3]

    def mmf(a, b):
        return jnp.dot(a, b, preferred_element_type=f32)

    def bias(r):                                     # (1, 128)
        return b_ref[pl.ds(r, 1), :]

    def wg(off, k):                                  # (k, 128) static row slice
        return wg_ref[pl.ds(off, k), :]

    A = a_ref[...]                                   # bf16 dense add-aggregation

    # ---- NodeConvolution: GraphConv -> ReLU -> GraphConv -> ReLU -> mean pool.
    # Each GraphConv's two matmuls (W_rel on aggregated messages, W_root on x) are
    # merged into one MXU pass: cat = agg + roll(x, in_dim); slab = [W_rel ; W_root].
    def node_conv(x_f32, in_dim, k):
        agg = mmf(A, x_f32.astype(bf16))                         # (N, 128) f32
        cat = agg + pltpu.roll(x_f32, in_dim, axis=1)
        z = mmf(cat[:, :K_NODE].astype(bf16), wn_ref[k]) + bias(k)
        return jnp.maximum(z, 0.0)

    h = node_conv(x_ref[...], F, _B_GC1)             # lanes [0, H1)
    h = node_conv(h, H1, _B_GC2)                     # lanes [0, H2)
    xg = mmf(pool_ref[...], h.astype(bf16))          # (G, 128) global mean pool

    # ---- fused graph_lin[0] + weight_layer (same input xg -> one MXU pass)
    res = mmf(xg[:, :H2_DIM], wg(_OFF_L1WL, _K_L1WL)) + bias(_B_L1WL)
    # graph_lin[1]: out_x = relu(lin2(relu(lin1(xg))))
    out_x = jnp.maximum(
        mmf(jnp.maximum(res[:, :L], 0.0), wg(_OFF_LIN2, _K_LIN2)) + bias(_B_LIN2),
        0.0)                                         # (G, 128), lanes [0, L)

    # weight_layer output lives in res lanes [32,64): roll back to [0,32) and mask.
    lane = lax.broadcasted_iota(jnp.int32, (G, LANES), 1)
    x_w = jnp.where(lane < L, pltpu.roll(res, LANES - L, axis=1), 0.0)

    # ---- learned adjacency: Gram-matrix pairwise distances (MXU), f32 throughout.
    rowi = lax.broadcasted_iota(jnp.int32, (G, G), 0)
    coli = lax.broadcasted_iota(jnp.int32, (G, G), 1)
    eye = (rowi == coli).astype(f32)
    gram = lax.dot_general(out_x, out_x, (((1,), (1,)), ((), ())),
                           preferred_element_type=f32)           # (G, G)
    r_col = jnp.sum(out_x * out_x, axis=1, keepdims=True)        # ||out_x_i||^2
    r_row = jnp.sum(gram * eye, axis=0, keepdims=True)           # ||out_x_j||^2
    d = jnp.maximum(r_col + r_row - 2.0 * gram, 0.0)             # clamp fp residue
    dist = -jnp.sqrt(d + eps) * (1.0 - eye)                      # self-dist masked
    # Reference adds the identity BEFORE the sigmoid: adj = sigmoid(temp*dist+theta+I)
    adj = jax.nn.sigmoid(temp * dist + theta + eye)              # (G, G), symmetric
    inv_rowsum = pl.reciprocal(jnp.sum(adj, axis=1, keepdims=True), approx=True)
    x_norm = jnp.maximum(mmf(adj, x_w) * inv_rowsum, 0.0)        # == g_x, lanes [0,L)

    # ---- graph_conv[0]: GraphConv(aggr='mean') with edge weights on the dense
    # graph; adj is symmetric and every node has G incoming edges -> (adj @ x)/G.
    agg_g = mmf(adj, x_norm) * (1.0 / G)
    cat_g = agg_g + pltpu.roll(x_norm, L, axis=1)
    x_gc = jnp.maximum(mmf(cat_g[:, :_K_GCG], wg(_OFF_GCG, _K_GCG)) + bias(_B_GCG),
                       0.0)                                      # lanes [0, GC_DIM)

    # ---- classifier: Linear(32,16) -> ReLU -> Linear(16,1)
    y1 = jnp.maximum(mmf(x_gc[:, :GC_DIM], wg(_OFF_FC1, _K_FC1)) + bias(_B_FC1), 0.0)
    logits = mmf(y1[:, :FC_DIM], wg(_OFF_FC2, _K_FC2)) + bias(_B_FC2)  # lane 0

    # ---- gaussian target distribution (matches the reference formula exactly)
    sub = lax.broadcasted_iota(jnp.int32, (G, 1), 0).astype(f32)
    val = jnp.exp(-((mu - (sub - 4.0) + 1.0) ** 2) / (sigma * sigma))
    t = jnp.where(sub >= 4.0, val, 0.0)
    t = t / jnp.sum(t, axis=0, keepdims=True)                    # (G, 1)

    # ---- outputs
    gx_ref[...] = x_norm                                          # (G, 128)
    adj_ref[...] = adj                                            # (G, G)
    misc_ref[...] = logits + t * (lane == 1).astype(f32)          # lane0=y, lane1=tgt


# ---------------------------------------------------------------------------
# Wrapper: one pallas_call + trivial constant/slice post-processing
# ---------------------------------------------------------------------------
def graph_in_graph_forward(params, x_nodes, A_node, P_pool, *, num_graphs):
    G = num_graphs
    N, F = x_nodes.shape
    x_pad = jnp.pad(x_nodes.astype(jnp.float32), ((0, 0), (0, LANES - F)))

    kern = functools.partial(_gig_kernel, G=G, F=F, H1=H1_DIM, L=L_DIM, eps=EPS_F32)
    vmem = pl.BlockSpec(memory_space=pltpu.MemorySpace.VMEM)
    smem = pl.BlockSpec(memory_space=pltpu.MemorySpace.SMEM)

    o_gx, o_adj, o_misc = pl.pallas_call(
        kern,
        out_shape=(jax.ShapeDtypeStruct((G, LANES), jnp.float32),
                   jax.ShapeDtypeStruct((G, G), jnp.float32),
                   jax.ShapeDtypeStruct((G, LANES), jnp.float32)),
        in_specs=[smem,          # temp/theta/mu/sigma
                  vmem,          # A_node (bf16)
                  vmem,          # node features (f32, lane-padded)
                  vmem,          # mean-pool matrix (bf16)
                  vmem,          # node-conv weight pack (bf16)
                  vmem,          # graph-level weight pack (f32)
                  vmem],         # bias pack (f32)
        out_specs=(vmem, vmem, vmem),
    )(params["scalars"], A_node.astype(jnp.bfloat16), x_pad,
      P_pool.astype(jnp.bfloat16), params["Wn"], params["Wg"], params["B"])

    g_x = o_gx[:, :L_DIM]                 # (G, 32)
    adj = o_adj                           # (G, G)
    y = o_misc[:, 0]                      # (G,)
    target_distr = o_misc[:, 1]           # (G,)
    edge_weight = adj.reshape(-1)         # row-major == adj[row, col] over all pairs
    # sigmoid(.) > 0 everywhere -> edge_index is the full G*G pair list (static).
    edge_index = jnp.asarray(
        np.stack([np.repeat(np.arange(G), G), np.tile(np.arange(G), G)]),
        dtype=jnp.int32)
    return y, g_x, edge_index, edge_weight, adj, target_distr


# ---------------------------------------------------------------------------
# Deterministic parameter / data construction (host-side packing, off the hot path)
# ---------------------------------------------------------------------------
def init_params(key):
    def dense(k, shape, scale=0.1):
        return scale * jax.random.normal(k, shape, dtype=jnp.float32)

    ks = jax.random.split(key, 19)
    gc1_wrel, gc1_wroot, gc1_b = (dense(ks[0], (F_IN, H1_DIM)),
                                  dense(ks[1], (F_IN, H1_DIM)),
                                  dense(ks[2], (H1_DIM,)))
    gc2_wrel, gc2_wroot, gc2_b = (dense(ks[3], (H1_DIM, H2_DIM)),
                                  dense(ks[4], (H1_DIM, H2_DIM)),
                                  dense(ks[5], (H2_DIM,)))
    lin1_w, lin1_b = dense(ks[6], (H2_DIM, L_DIM)), dense(ks[7], (L_DIM,))
    lin2_w, lin2_b = dense(ks[8], (L_DIM, L_DIM)), dense(ks[9], (L_DIM,))
    wl_w, wl_b = dense(ks[10], (H2_DIM, L_DIM)), dense(ks[11], (L_DIM,))
    gcg_wrel, gcg_wroot, gcg_b = (dense(ks[12], (L_DIM, GC_DIM)),
                                  dense(ks[13], (L_DIM, GC_DIM)),
                                  dense(ks[14], (GC_DIM,)))
    fc1_w, fc1_b = dense(ks[15], (GC_DIM, FC_DIM)), dense(ks[16], (FC_DIM,))
    fc2_w, fc2_b = dense(ks[17], (FC_DIM, 1)), dense(ks[18], (1,))

    # node-level GraphConv slabs: bf16, true-K (=32) deep, [W_rel ; W_root] rows
    Wn = jnp.zeros((2, K_NODE, LANES), jnp.float32)
    Wn = Wn.at[0, :F_IN, :H1_DIM].set(gc1_wrel)
    Wn = Wn.at[0, F_IN:2 * F_IN, :H1_DIM].set(gc1_wroot)
    Wn = Wn.at[1, :H1_DIM, :H2_DIM].set(gc2_wrel)
    Wn = Wn.at[1, H1_DIM:2 * H1_DIM, :H2_DIM].set(gc2_wroot)
    Wn = Wn.astype(jnp.bfloat16)

    # graph-level weights: one row-concatenated f32 pack at true contraction depth
    Wg = jnp.zeros((WG_ROWS, LANES), jnp.float32)
    Wg = Wg.at[_OFF_L1WL:_OFF_L1WL + H2_DIM, :L_DIM].set(lin1_w)          # LIN1
    Wg = Wg.at[_OFF_L1WL:_OFF_L1WL + H2_DIM, L_DIM:2 * L_DIM].set(wl_w)   # weight_layer
    Wg = Wg.at[_OFF_LIN2:_OFF_LIN2 + L_DIM, :L_DIM].set(lin2_w)
    Wg = Wg.at[_OFF_GCG:_OFF_GCG + L_DIM, :GC_DIM].set(gcg_wrel)
    Wg = Wg.at[_OFF_GCG + L_DIM:_OFF_GCG + 2 * L_DIM, :GC_DIM].set(gcg_wroot)
    Wg = Wg.at[_OFF_FC1:_OFF_FC1 + GC_DIM, :FC_DIM].set(fc1_w)
    Wg = Wg.at[_OFF_FC2:_OFF_FC2 + FC_DIM, :1].set(fc2_w)

    B = jnp.zeros((8, LANES), jnp.float32)
    B = B.at[_B_GC1, :H1_DIM].set(gc1_b)
    B = B.at[_B_GC2, :H2_DIM].set(gc2_b)
    B = B.at[_B_L1WL, :L_DIM].set(lin1_b).at[_B_L1WL, L_DIM:2 * L_DIM].set(wl_b)
    B = B.at[_B_LIN2, :L_DIM].set(lin2_b)
    B = B.at[_B_GCG, :GC_DIM].set(gcg_b)
    B = B.at[_B_FC1, :FC_DIM].set(fc1_b)
    B = B.at[_B_FC2, :1].set(fc2_b)

    # temp, theta, mu, sigma
    scalars = jnp.array([1.0, 0.5, 9.0, 3.0], dtype=jnp.float32)
    return {"Wn": Wn, "Wg": Wg, "B": B, "scalars": scalars}


def build_graph_batch(key, num_graphs=8, nodes_per_graph=16, num_features=4):
    N = num_graphs * nodes_per_graph
    x = jax.random.normal(key, (N, num_features), dtype=jnp.float32)

    # Ring edges inside each graph (both directions), deterministic.
    local = jnp.arange(nodes_per_graph, dtype=jnp.int32)
    offs = (jnp.arange(num_graphs, dtype=jnp.int32) * nodes_per_graph)[:, None]
    src_f = (offs + local[None, :]).reshape(-1)
    dst_f = (offs + ((local + 1) % nodes_per_graph)[None, :]).reshape(-1)
    src = jnp.concatenate([src_f, dst_f])
    dst = jnp.concatenate([dst_f, src_f])

    # Dense add-aggregation matrix (message src -> target dst).
    A_node = jnp.zeros((N, N), jnp.float32).at[dst, src].add(1.0)

    # Mean-pool matrix: P[g, n] = 1/nodes_per_graph if batch[n] == g.
    batch = jnp.repeat(jnp.arange(num_graphs, dtype=jnp.int32), nodes_per_graph)
    P_pool = (batch[None, :] == jnp.arange(num_graphs, dtype=jnp.int32)[:, None]
              ).astype(jnp.float32) / float(nodes_per_graph)
    return x, A_node, P_pool


# ---------------------------------------------------------------------------

if __name__ == "__main__":
    key = jax.random.PRNGKey(0)
    k_data, k_param = jax.random.split(key)

    NUM_GRAPHS = 8
    x_nodes, A_node, P_pool = build_graph_batch(k_data, num_graphs=NUM_GRAPHS,
                                                nodes_per_graph=16,
                                                num_features=F_IN)
    params = init_params(k_param)

    fwd = jax.jit(functools.partial(graph_in_graph_forward, num_graphs=NUM_GRAPHS))
    y, g_x, edge_index, edge_weight, adj, target_distr = fwd(
        params, x_nodes, A_node, P_pool)
    jax.block_until_ready((y, g_x, edge_index, edge_weight, adj, target_distr))

    assert y.shape == (NUM_GRAPHS,)
    assert g_x.shape == (NUM_GRAPHS, L_DIM)
    assert edge_index.shape == (2, NUM_GRAPHS * NUM_GRAPHS)
    assert edge_weight.shape == (NUM_GRAPHS * NUM_GRAPHS,)
    assert adj.shape == (NUM_GRAPHS, NUM_GRAPHS)
    assert target_distr.shape == (NUM_GRAPHS,)
    assert bool(jnp.isfinite(y).all()) and bool(jnp.isfinite(adj).all())
    assert bool(jnp.isfinite(g_x).all()) and bool(jnp.isfinite(target_distr).all())
    print("KERNEL_OK")
</pallas_src>

<mosaic_0001>
module attributes {stable_mosaic.version = 11 : i64} {
  func.func @_gig_kernel(%arg0: memref<4xf32, #tpu.memory_space<smem>>, %arg1: memref<128x128xbf16, #tpu.memory_space<vmem>>, %arg2: memref<128x128xf32, #tpu.memory_space<vmem>>, %arg3: memref<8x128xbf16, #tpu.memory_space<vmem>>, %arg4: memref<2x32x128xbf16, #tpu.memory_space<vmem>>, %arg5: memref<176x128xf32, #tpu.memory_space<vmem>>, %arg6: memref<8x128xf32, #tpu.memory_space<vmem>>, %arg7: memref<8x128xf32, #tpu.memory_space<vmem>>, %arg8: memref<8x8xf32, #tpu.memory_space<vmem>>, %arg9: memref<8x128xf32, #tpu.memory_space<vmem>>) attributes {dimension_semantics = [], scalar_prefetch = 0 : i64, scratch_operands = 0 : i64, tpu.core_type = #tpu.core_type<tc>} {
    %c0 = arith.constant 0 : index
    %0 = memref.load %arg0[%c0] : memref<4xf32, #tpu.memory_space<smem>>
    %c1 = arith.constant 1 : index
    %1 = memref.load %arg0[%c1] : memref<4xf32, #tpu.memory_space<smem>>
    %c2 = arith.constant 2 : index
    %2 = memref.load %arg0[%c2] : memref<4xf32, #tpu.memory_space<smem>>
    %c3 = arith.constant 3 : index
    %3 = memref.load %arg0[%c3] : memref<4xf32, #tpu.memory_space<smem>>
    %c0_0 = arith.constant 0 : index
    %c0_1 = arith.constant 0 : index
    %4 = vector.load %arg1[%c0_0, %c0_1] : memref<128x128xbf16, #tpu.memory_space<vmem>>, vector<128x128xbf16>
    %c0_2 = arith.constant 0 : index
    %c0_3 = arith.constant 0 : index
    %5 = vector.load %arg2[%c0_2, %c0_3] : memref<128x128xf32, #tpu.memory_space<vmem>>, vector<128x128xf32>
    %6 = arith.truncf %5 : vector<128x128xf32> to vector<128x128xbf16>
    %cst = arith.constant dense<0.000000e+00> : vector<128x128xf32>
    %7 = tpu.matmul %4, %6, %cst {dimension_numbers = #tpu.dot_dimension_numbers<[1], [0], [0], [1], [0, 0, 1, 1], [], []>} : vector<128x128xbf16>, vector<128x128xbf16>, vector<128x128xf32> -> vector<128x128xf32>
    %c4_i32 = arith.constant 4 : i32
    %8 = tpu.dynamic_rotate %5 by %c4_i32 dim 1 : vector<128x128xf32>, i32 -> vector<128x128xf32>
    %9 = arith.addf %7, %8 : vector<128x128xf32>
    %10 = vector.extract_strided_slice %9 {offsets = [0, 0], sizes = [128, 32], strides = [1, 1]} : vector<128x128xf32> to vector<128x32xf32>
    %11 = arith.truncf %10 : vector<128x32xf32> to vector<128x32xbf16>
    %c0_4 = arith.constant 0 : index
    %c0_5 = arith.constant 0 : index
    %c0_6 = arith.constant 0 : index
    %12 = vector.load %arg4[%c0_4, %c0_5, %c0_6] : memref<2x32x128xbf16, #tpu.memory_space<vmem>>, vector<1x32x128xbf16>
    %13 = vector.shape_cast %12 : vector<1x32x128xbf16> to vector<32x128xbf16>
    %cst_7 = arith.constant dense<0.000000e+00> : vector<128x128xf32>
    %14 = tpu.matmul %11, %13, %cst_7 {dimension_numbers = #tpu.dot_dimension_numbers<[1], [0], [0], [1], [0, 0, 1, 1], [], []>} : vector<128x32xbf16>, vector<32x128xbf16>, vector<128x128xf32> -> vector<128x128xf32>
    %c0_8 = arith.constant 0 : index
    %c0_9 = arith.constant 0 : index
    %15 = vector.load %arg6[%c0_8, %c0_9] : memref<8x128xf32, #tpu.memory_space<vmem>>, vector<1x128xf32>
    %16 = vector.broadcast %15 : vector<1x128xf32> to vector<128x128xf32>
    %17 = arith.addf %14, %16 : vector<128x128xf32>
    %cst_10 = arith.constant 0.000000e+00 : f32
    %18 = vector.broadcast %cst_10 : f32 to vector<128x128xf32>
    %19 = arith.maximumf %17, %18 : vector<128x128xf32>
    %20 = arith.truncf %19 : vector<128x128xf32> to vector<128x128xbf16>
    %cst_11 = arith.constant dense<0.000000e+00> : vector<128x128xf32>
    %21 = tpu.matmul %4, %20, %cst_11 {dimension_numbers = #tpu.dot_dimension_numbers<[1], [0], [0], [1], [0, 0, 1, 1], [], []>} : vector<128x128xbf16>, vector<128x128xbf16>, vector<128x128xf32> -> vector<128x128xf32>
    %c16_i32 = arith.constant 16 : i32
    %22 = tpu.dynamic_rotate %19 by %c16_i32 dim 1 : vector<128x128xf32>, i32 -> vector<128x128xf32>
    %23 = arith.addf %21, %22 : vector<128x128xf32>
    %24 = vector.extract_strided_slice %23 {offsets = [0, 0], sizes = [128, 32], strides = [1, 1]} : vector<128x128xf32> to vector<128x32xf32>
    %25 = arith.truncf %24 : vector<128x32xf32> to vector<128x32xbf16>
    %c1_12 = arith.constant 1 : index
    %c0_13 = arith.constant 0 : index
    %c0_14 = arith.constant 0 : index
    %26 = vector.load %arg4[%c1_12, %c0_13, %c0_14] : memref<2x32x128xbf16, #tpu.memory_space<vmem>>, vector<1x32x128xbf16>
    %27 = vector.shape_cast %26 : vector<1x32x128xbf16> to vector<32x128xbf16>
    %cst_15 = arith.constant dense<0.000000e+00> : vector<128x128xf32>
    %28 = tpu.matmul %25, %27, %cst_15 {dimension_numbers = #tpu.dot_dimension_numbers<[1], [0], [0], [1], [0, 0, 1, 1], [], []>} : vector<128x32xbf16>, vector<32x128xbf16>, vector<128x128xf32> -> vector<128x128xf32>
    %c1_16 = arith.constant 1 : index
    %c0_17 = arith.constant 0 : index
    %29 = vector.load %arg6[%c1_16, %c0_17] : memref<8x128xf32, #tpu.memory_space<vmem>>, vector<1x128xf32>
    %30 = vector.broadcast %29 : vector<1x128xf32> to vector<128x128xf32>
    %31 = arith.addf %28, %30 : vector<128x128xf32>
    %cst_18 = arith.constant 0.000000e+00 : f32
    %32 = vector.broadcast %cst_18 : f32 to vector<128x128xf32>
    %33 = arith.maximumf %31, %32 : vector<128x128xf32>
    %c0_19 = arith.constant 0 : index
    %c0_20 = arith.constant 0 : index
    %34 = vector.load %arg3[%c0_19, %c0_20] : memref<8x128xbf16, #tpu.memory_space<vmem>>, vector<8x128xbf16>
    %35 = arith.truncf %33 : vector<128x128xf32> to vector<128x128xbf16>
    %cst_21 = arith.constant dense<0.000000e+00> : vector<8x128xf32>
    %36 = tpu.matmul %34, %35, %cst_21 {dimension_numbers = #tpu.dot_dimension_numbers<[1], [0], [0], [1], [0, 0, 1, 1], [], []>} : vector<8x128xbf16>, vector<128x128xbf16>, vector<8x128xf32> -> vector<8x128xf32>
    %37 = vector.extract_strided_slice %36 {offsets = [0, 0], sizes = [8, 32], strides = [1, 1]} : vector<8x128xf32> to vector<8x32xf32>
    %c0_22 = arith.constant 0 : index
    %c0_23 = arith.constant 0 : index
    %38 = vector.load %arg5[%c0_22, %c0_23] : memref<176x128xf32, #tpu.memory_space<vmem>>, vector<32x128xf32>
    %cst_24 = arith.constant dense<0.000000e+00> : vector<8x128xf32>
    %39 = tpu.matmul %37, %38, %cst_24 {dimension_numbers = #tpu.dot_dimension_numbers<[1], [0], [0], [1], [0, 0, 1, 1], [], []>} : vector<8x32xf32>, vector<32x128xf32>, vector<8x128xf32> -> vector<8x128xf32>
    %c2_25 = arith.constant 2 : index
    %c0_26 = arith.constant 0 : index
    %40 = vector.load %arg6[%c2_25, %c0_26] : memref<8x128xf32, #tpu.memory_space<vmem>>, vector<1x128xf32>
    %41 = vector.broadcast %40 : vector<1x128xf32> to vector<8x128xf32>
    %42 = arith.addf %39, %41 : vector<8x128xf32>
    %43 = vector.extract_strided_slice %42 {offsets = [0, 0], sizes = [8, 32], strides = [1, 1]} : vector<8x128xf32> to vector<8x32xf32>
    %cst_27 = arith.constant 0.000000e+00 : f32
    %44 = vector.broadcast %cst_27 : f32 to vector<8x32xf32>
    %45 = arith.maximumf %43, %44 : vector<8x32xf32>
    %c32 = arith.constant 32 : index
    %c0_28 = arith.constant 0 : index
    %46 = vector.load %arg5[%c32, %c0_28] : memref<176x128xf32, #tpu.memory_space<vmem>>, vector<32x128xf32>
    %cst_29 = arith.constant dense<0.000000e+00> : vector<8x128xf32>
    %47 = tpu.matmul %45, %46, %cst_29 {dimension_numbers = #tpu.dot_dimension_numbers<[1], [0], [0], [1], [0, 0, 1, 1], [], []>} : vector<8x32xf32>, vector<32x128xf32>, vector<8x128xf32> -> vector<8x128xf32>
    %c3_30 = arith.constant 3 : index
    %c0_31 = arith.constant 0 : index
    %48 = vector.load %arg6[%c3_30, %c0_31] : memref<8x128xf32, #tpu.memory_space<vmem>>, vector<1x128xf32>
    %49 = vector.broadcast %48 : vector<1x128xf32> to vector<8x128xf32>
    %50 = arith.addf %47, %49 : vector<8x128xf32>
    %cst_32 = arith.constant 0.000000e+00 : f32
    %51 = vector.broadcast %cst_32 : f32 to vector<8x128xf32>
    %52 = arith.maximumf %50, %51 : vector<8x128xf32>
    %53 = tpu.iota {dimensions = array<i32: 1>} : vector<8x128xi32>
    %c32_i32 = arith.constant 32 : i32
    %54 = vector.broadcast %c32_i32 : i32 to vector<8x128xi32>
    %55 = arith.cmpi slt, %53, %54 : vector<8x128xi32>
    %c96_i32 = arith.constant 96 : i32
    %56 = tpu.dynamic_rotate %42 by %c96_i32 dim 1 : vector<8x128xf32>, i32 -> vector<8x128xf32>
    %cst_33 = arith.constant 0.000000e+00 : f32
    %57 = vector.broadcast %cst_33 : f32 to vector<8x128xf32>
    %58 = arith.select %55, %56, %57 : vector<8x128xi1>, vector<8x128xf32>
    %59 = tpu.iota {dimensions = array<i32: 0>} : vector<8x8xi32>
    %60 = tpu.iota {dimensions = array<i32: 1>} : vector<8x8xi32>
    %61 = arith.cmpi eq, %59, %60 : vector<8x8xi32>
    %62 = arith.extui %61 : vector<8x8xi1> to vector<8x8xi32>
    %63 = arith.sitofp %62 : vector<8x8xi32> to vector<8x8xf32>
    %cst_34 = arith.constant dense<0.000000e+00> : vector<8x8xf32>
    %64 = tpu.matmul %52, %52, %cst_34 {dimension_numbers = #tpu.dot_dimension_numbers<[1], [1], [0], [0], [0, 0, 1, 0], [], []>} : vector<8x128xf32>, vector<8x128xf32>, vector<8x8xf32> -> vector<8x8xf32>
    %65 = arith.mulf %52, %52 : vector<8x128xf32>
    %cst_35 = arith.constant dense<0.000000e+00> : vector<8xf32>
    %66 = vector.multi_reduction <add>, %65, %cst_35 [1] : vector<8x128xf32> to vector<8xf32>
    %67 = vector.shape_cast %66 : vector<8xf32> to vector<8x1xf32>
    %68 = arith.mulf %64, %63 : vector<8x8xf32>
    %cst_36 = arith.constant dense<0.000000e+00> : vector<8xf32>
    %69 = vector.multi_reduction <add>, %68, %cst_36 [0] : vector<8x8xf32> to vector<8xf32>
    %70 = vector.shape_cast %69 : vector<8xf32> to vector<1x8xf32>
    %71 = vector.broadcast %67 : vector<8x1xf32> to vector<8x8xf32>
    %72 = vector.broadcast %70 : vector<1x8xf32> to vector<8x8xf32>
    %73 = arith.addf %71, %72 : vector<8x8xf32>
    %cst_37 = arith.constant 2.000000e+00 : f32
    %74 = vector.broadcast %cst_37 : f32 to vector<8x8xf32>
    %75 = arith.mulf %74, %64 : vector<8x8xf32>
    %76 = arith.subf %73, %75 : vector<8x8xf32>
    %cst_38 = arith.constant 0.000000e+00 : f32
    %77 = vector.broadcast %cst_38 : f32 to vector<8x8xf32>
    %78 = arith.maximumf %76, %77 : vector<8x8xf32>
    %cst_39 = arith.constant 1.1920929E-7 : f32
    %79 = vector.broadcast %cst_39 : f32 to vector<8x8xf32>
    %80 = arith.addf %78, %79 : vector<8x8xf32>
    %81 = math.sqrt %80 : vector<8x8xf32>
    %cst_40 = arith.constant 0.000000e+00 : f32
    %82 = vector.broadcast %cst_40 : f32 to vector<8x8xf32>
    %83 = arith.subf %82, %81 : vector<8x8xf32>
    %cst_41 = arith.constant 1.000000e+00 : f32
    %84 = vector.broadcast %cst_41 : f32 to vector<8x8xf32>
    %85 = arith.subf %84, %63 : vector<8x8xf32>
    %86 = arith.mulf %83, %85 : vector<8x8xf32>
    %87 = vector.broadcast %0 : f32 to vector<8x8xf32>
    %88 = arith.mulf %87, %86 : vector<8x8xf32>
    %89 = vector.broadcast %1 : f32 to vector<8x8xf32>
    %90 = arith.addf %88, %89 : vector<8x8xf32>
    %91 = arith.addf %90, %63 : vector<8x8xf32>
    %92 = arith.negf %91 : vector<8x8xf32>
    %93 = math.exp %92 : vector<8x8xf32>
    %cst_42 = arith.constant 1.000000e+00 : f32
    %94 = vector.broadcast %cst_42 : f32 to vector<8x8xf32>
    %95 = arith.addf %94, %93 : vector<8x8xf32>
    %96 = arith.divf %94, %95 : vector<8x8xf32>
    %cst_43 = arith.constant dense<0.000000e+00> : vector<8xf32>
    %97 = vector.multi_reduction <add>, %96, %cst_43 [1] : vector<8x8xf32> to vector<8xf32>
    %98 = vector.shape_cast %97 : vector<8xf32> to vector<8x1xf32>
    %99 = tpu.reciprocal %98 {approx = true} : vector<8x1xf32> -> vector<8x1xf32>
    %cst_44 = arith.constant dense<0.000000e+00> : vector<8x128xf32>
    %100 = tpu.matmul %96, %58, %cst_44 {dimension_numbers = #tpu.dot_dimension_numbers<[1], [0], [0], [1], [0, 0, 1, 1], [], []>} : vector<8x8xf32>, vector<8x128xf32>, vector<8x128xf32> -> vector<8x128xf32>
    %101 = vector.broadcast %99 : vector<8x1xf32> to vector<8x128xf32>
    %102 = arith.mulf %100, %101 : vector<8x128xf32>
    %cst_45 = arith.constant 0.000000e+00 : f32
    %103 = vector.broadcast %cst_45 : f32 to vector<8x128xf32>
    %104 = arith.maximumf %102, %103 : vector<8x128xf32>
    %cst_46 = arith.constant dense<0.000000e+00> : vector<8x128xf32>
    %105 = tpu.matmul %96, %104, %cst_46 {dimension_numbers = #tpu.dot_dimension_numbers<[1], [0], [0], [1], [0, 0, 1, 1], [], []>} : vector<8x8xf32>, vector<8x128xf32>, vector<8x128xf32> -> vector<8x128xf32>
    %cst_47 = arith.constant 1.250000e-01 : f32
    %106 = vector.broadcast %cst_47 : f32 to vector<8x128xf32>
    %107 = arith.mulf %105, %106 : vector<8x128xf32>
    %c32_i32_48 = arith.constant 32 : i32
    %108 = tpu.dynamic_rotate %104 by %c32_i32_48 dim 1 : vector<8x128xf32>, i32 -> vector<8x128xf32>
    %109 = arith.addf %107, %108 : vector<8x128xf32>
    %110 = vector.extract_strided_slice %109 {offsets = [0, 0], sizes = [8, 64], strides = [1, 1]} : vector<8x128xf32> to vector<8x64xf32>
    %c64 = arith.constant 64 : index
    %c0_49 = arith.constant 0 : index
    %111 = vector.load %arg5[%c64, %c0_49] : memref<176x128xf32, #tpu.memory_space<vmem>>, vector<64x128xf32>
    %cst_50 = arith.constant dense<0.000000e+00> : vector<8x128xf32>
    %112 = tpu.matmul %110, %111, %cst_50 {dimension_numbers = #tpu.dot_dimension_numbers<[1], [0], [0], [1], [0, 0, 1, 1], [], []>} : vector<8x64xf32>, vector<64x128xf32>, vector<8x128xf32> -> vector<8x128xf32>
    %c4 = arith.constant 4 : index
    %c0_51 = arith.constant 0 : index
    %113 = vector.load %arg6[%c4, %c0_51] : memref<8x128xf32, #tpu.memory_space<vmem>>, vector<1x128xf32>
    %114 = vector.broadcast %113 : vector<1x128xf32> to vector<8x128xf32>
    %115 = arith.addf %112, %114 : vector<8x128xf32>
    %cst_52 = arith.constant 0.000000e+00 : f32
    %116 = vector.broadcast %cst_52 : f32 to vector<8x128xf32>
    %117 = arith.maximumf %115, %116 : vector<8x128xf32>
    %118 = vector.extract_strided_slice %117 {offsets = [0, 0], sizes = [8, 32], strides = [1, 1]} : vector<8x128xf32> to vector<8x32xf32>
    %c128 = arith.constant 128 : index
    %c0_53 = arith.constant 0 : index
    %119 = vector.load %arg5[%c128, %c0_53] : memref<176x128xf32, #tpu.memory_space<vmem>>, vector<32x128xf32>
    %cst_54 = arith.constant dense<0.000000e+00> : vector<8x128xf32>
    %120 = tpu.matmul %118, %119, %cst_54 {dimension_numbers = #tpu.dot_dimension_numbers<[1], [0], [0], [1], [0, 0, 1, 1], [], []>} : vector<8x32xf32>, vector<32x128xf32>, vector<8x128xf32> -> vector<8x128xf32>
    %c5 = arith.constant 5 : index
    %c0_55 = arith.constant 0 : index
    %121 = vector.load %arg6[%c5, %c0_55] : memref<8x128xf32, #tpu.memory_space<vmem>>, vector<1x128xf32>
    %122 = vector.broadcast %121 : vector<1x128xf32> to vector<8x128xf32>
    %123 = arith.addf %120, %122 : vector<8x128xf32>
    %cst_56 = arith.constant 0.000000e+00 : f32
    %124 = vector.broadcast %cst_56 : f32 to vector<8x128xf32>
    %125 = arith.maximumf %123, %124 : vector<8x128xf32>
    %126 = vector.extract_strided_slice %125 {offsets = [0, 0], sizes = [8, 16], strides = [1, 1]} : vector<8x128xf32> to vector<8x16xf32>
    %c160 = arith.constant 160 : index
    %c0_57 = arith.constant 0 : index
    %127 = vector.load %arg5[%c160, %c0_57] : memref<176x128xf32, #tpu.memory_space<vmem>>, vector<16x128xf32>
    %cst_58 = arith.constant dense<0.000000e+00> : vector<8x128xf32>
    %128 = tpu.matmul %126, %127, %cst_58 {dimension_numbers = #tpu.dot_dimension_numbers<[1], [0], [0], [1], [0, 0, 1, 1], [], []>} : vector<8x16xf32>, vector<16x128xf32>, vector<8x128xf32> -> vector<8x128xf32>
    %c6 = arith.constant 6 : index
    %c0_59 = arith.constant 0 : index
    %129 = vector.load %arg6[%c6, %c0_59] : memref<8x128xf32, #tpu.memory_space<vmem>>, vector<1x128xf32>
    %130 = vector.broadcast %129 : vector<1x128xf32> to vector<8x128xf32>
    %131 = arith.addf %128, %130 : vector<8x128xf32>
    %132 = tpu.iota {dimensions = array<i32: 0>} : vector<8x1xi32>
    %133 = arith.sitofp %132 : vector<8x1xi32> to vector<8x1xf32>
    %cst_60 = arith.constant 4.000000e+00 : f32
    %134 = vector.broadcast %cst_60 : f32 to vector<8x1xf32>
    %135 = arith.subf %133, %134 : vector<8x1xf32>
    %136 = vector.broadcast %2 : f32 to vector<8x1xf32>
    %137 = arith.subf %136, %135 : vector<8x1xf32>
    %cst_61 = arith.constant 1.000000e+00 : f32
    %138 = vector.broadcast %cst_61 : f32 to vector<8x1xf32>
    %139 = arith.addf %137, %138 : vector<8x1xf32>
    %140 = arith.mulf %139, %139 : vector<8x1xf32>
    %cst_62 = arith.constant 0.000000e+00 : f32
    %141 = vector.broadcast %cst_62 : f32 to vector<8x1xf32>
    %142 = arith.subf %141, %140 : vector<8x1xf32>
    %143 = arith.mulf %3, %3 : f32
    %144 = vector.broadcast %143 : f32 to vector<8x1xf32>
    %145 = arith.divf %142, %144 : vector<8x1xf32>
    %146 = math.exp %145 : vector<8x1xf32>
    %cst_63 = arith.constant 4.000000e+00 : f32
    %147 = vector.broadcast %cst_63 : f32 to vector<8x1xf32>
    %148 = arith.cmpf oge, %133, %147 : vector<8x1xf32>
    %cst_64 = arith.constant 0.000000e+00 : f32
    %149 = vector.broadcast %cst_64 : f32 to vector<8x1xf32>
    %150 = arith.select %148, %146, %149 : vector<8x1xi1>, vector<8x1xf32>
    %cst_65 = arith.constant dense<0.000000e+00> : vector<1xf32>
    %151 = vector.multi_reduction <add>, %150, %cst_65 [0] : vector<8x1xf32> to vector<1xf32>
    %152 = vector.shape_cast %151 : vector<1xf32> to vector<1x1xf32>
    %153 = vector.broadcast %152 : vector<1x1xf32> to vector<8x1xf32>
    %154 = arith.divf %150, %153 : vector<8x1xf32>
    %c0_66 = arith.constant 0 : index
    %c0_67 = arith.constant 0 : index
    %155 = vector.load %arg7[%c0_66, %c0_67] : memref<8x128xf32, #tpu.memory_space<vmem>>, vector<8x128xf32>
    tpu.vector_store %arg7[%c0_66, %c0_67], %104 {strides = array<i32>} : memref<8x128xf32, #tpu.memory_space<vmem>>, vector<8x128xf32>,
    %c0_68 = arith.constant 0 : index
    %c0_69 = arith.constant 0 : index
    %156 = vector.load %arg8[%c0_68, %c0_69] : memref<8x8xf32, #tpu.memory_space<vmem>>, vector<8x8xf32>
    tpu.vector_store %arg8[%c0_68, %c0_69], %96 {strides = array<i32>} : memref<8x8xf32, #tpu.memory_space<vmem>>, vector<8x8xf32>,
    %c1_i32 = arith.constant 1 : i32
    %157 = vector.broadcast %c1_i32 : i32 to vector<8x128xi32>
    %158 = arith.cmpi eq, %53, %157 : vector<8x128xi32>
    %159 = arith.extui %158 : vector<8x128xi1> to vector<8x128xi32>
    %160 = arith.sitofp %159 : vector<8x128xi32> to vector<8x128xf32>
    %161 = vector.broadcast %154 : vector<8x1xf32> to vector<8x128xf32>
    %162 = arith.mulf %161, %160 : vector<8x128xf32>
    %163 = arith.addf %131, %162 : vector<8x128xf32>
    %c0_70 = arith.constant 0 : index
    %c0_71 = arith.constant 0 : index
    %164 = vector.load %arg9[%c0_70, %c0_71] : memref<8x128xf32, #tpu.memory_space<vmem>>, vector<8x128xf32>
    tpu.vector_store %arg9[%c0_70, %c0_71], %163 {strides = array<i32>} : memref<8x128xf32, #tpu.memory_space<vmem>>, vector<8x128xf32>,
    return
  }
}

</mosaic_0001>

<bundles_post_ra>
// kernel: graph_in_graph_forward.1
= control target key start
LH: loop header
LB: loop body
LE: loop exit
PB: predicated region body
PF: predicated region fallthrough
CT: control target
= control target key end

     0   :  { %15 = vsyncpa [#allocation4], 0  ;;  %s1461_s0 = inlined_call_operand.vmem [shape: f32[4], index: 0, kind: input, shape index: {}]   ;;  %s1462_s1 = inlined_call_operand.vmem [shape: bf16[128,128], index: 1, kind: input, shape index: {}]   ;;  %s1463_s2 = inlined_call_operand.vmem [shape: f32[128,128], index: 2, kind: input, shape index: {}]   ;;  %s1464_s3 = inlined_call_operand.vmem [shape: bf16[8,128], index: 3, kind: input, shape index: {}]   ;;  %s1465_s4 = inlined_call_operand.vmem [shape: bf16[2,32,128], index: 4, kind: input, shape index: {}]   ;;  %s1466_s5 = inlined_call_operand.vmem [shape: f32[176,128], index: 5, kind: input, shape index: {}]   ;;  %s1467_s6 = inlined_call_operand.vmem [shape: f32[8,128], index: 6, kind: input, shape index: {}]   ;;  %s1468_s7 = inlined_call_operand.hbm [shape: f32[8,128], index: 7, kind: output, shape index: {0}]   ;;  %s1469_s8 = inlined_call_operand.vmem [shape: f32[8,8], index: 8, kind: output, shape index: {1}]   ;;  %s1470_s9 = inlined_call_operand.vmem [shape: f32[8,128], index: 9, kind: output, shape index: {2}]  }
   0x1   :  { %16 = vsyncpa [#allocation3], 0  ;;  %s22_s11 = sshll.u32 %s1461_s0, 4  ;;  %s1098_s12 = smov [#allocation2]   ;;  %s23_s11 = int_to_ptr.vmem [resolvable:$true] %s22_s11 }
   0x2   :  { %25 = dma.vmem_to_smem %s23_s11, 16, %s1098_s12, [#allocation4]  }
   0x3   :  { %1094 = dma.done.wait [#allocation4], 16  }
   0x4   :  { %1095 = vsyncadd [#allocation4], 4294967280 }
   0x5   :  { %42 = sfence }
   0x6   :  { %v78_v0 = vld [vmem:[%s1463_s2 + $0x70] sm:$0xff]  ;;  %v79_v1 = vld [vmem:[%s1463_s2 + $0x78] sm:$0xff]  ;;  %v76_v2 = vld [vmem:[%s1463_s2 + $0x60] sm:$0xff]  ;;  %s1099_s28 = smov 4   ;;  %vm243_vm0 = vcmask 261120   ;;  %s1100_s21 = smov 16  }
   0x7   :  { %v87_v3 = vpack.c.bf16 %v79_v1, %v78_v0  ;;  %v77_v4 = vld [vmem:[%s1463_s2 + $0x68] sm:$0xff]  ;;  %v68_v6 = vld [vmem:[%s1463_s2 + $0x20] sm:$0xff]  ;;  %v74_v7 = vld [vmem:[%s1463_s2 + $0x50] sm:$0xff]  ;;  %s1101_s22 = smov 96   ;;  %vm655_vm3 = vcmask 64512   ;;  %s44_s24 = sld [smem:[#allocation2]] }
   0x8   :  { %v86_v5 = vpack.c.bf16 %v77_v4, %v76_v2  ;;  %v75_v8 = vld [vmem:[%s1463_s2 + $0x58] sm:$0xff]  ;;  %v64_v9 = vld [vmem:[%s1463_s2] sm:$0xff]  ;;  %96 = vrot.lane.b32.xlu2 %v68_v6, %s1099_s28  ;;  %v66_v10 = vld [vmem:[%s1463_s2 + $0x10] sm:$0xff]  ;;  %s1103_s27 = smov 32   ;;  %vm770_vm10 = vcmask 523264   ;;  %vm829_vm11 = vcmask 130048  }
   0x9   :  { %168 = vmatpush.bf16.msra.mxu0 %v87_v3  ;;  %88 = vrot.lane.b32.xlu0 %v64_v9, %s1099_s28  ;;  %v85_v11 = vpack.c.bf16 %v75_v8, %v74_v7  ;;  %v72_v12 = vld [vmem:[%s1463_s2 + $0x40] sm:$0xff]  ;;  %v73_v13 = vld [vmem:[%s1463_s2 + $0x48] sm:$0xff]  ;;  %v70_v16 = vld [vmem:[%s1463_s2 + $0x30] sm:$0xff]  ;;  %s1104_s11 = smov [#allocation5]   ;;  %s917_s15 = sshll.u32 %s1468_s7, 4  ;;  %s918_s15 = int_to_ptr.hbm [resolvable:$true] %s917_s15 }
   0xa   :  { %92 = vrot.lane.b32.xlu1 %v66_v10, %s1099_s28  ;;  %v84_v14 = vpack.c.bf16 %v73_v13, %v72_v12  ;;  %v69_v15 = vld [vmem:[%s1463_s2 + $0x28] sm:$0xff]  ;;  %v71_v17 = vld [vmem:[%s1463_s2 + $0x38] sm:$0xff]  ;;  %v1220_v24 = vld [vmem:[%s1462_s1] sm:$0xff]  ;;  %s915_s12 = sshll.u32 %s1104_s11, 4  ;;  %s936_s17 = sld [smem:[#allocation2 + $0x2]]  ;;  %s916_s12 = int_to_ptr.vmem [resolvable:$true] %s915_s12 }
   0xb   :  { %v65_v18 = vld [vmem:[%s1463_s2 + $0x8] sm:$0xff]  ;;  %v67_v19 = vld [vmem:[%s1463_s2 + $0x18] sm:$0xff]  ;;  %v83_v20 = vpack.c.bf16 %v71_v17, %v70_v16  ;;  %v82_v21 = vpack.c.bf16 %v69_v15, %v68_v6  ;;  %v1237_v26 = vld [vmem:[%s1462_s1 + $0x10] sm:$0xff] }
   0xc   :  { %v81_v22 = vpack.c.bf16 %v67_v19, %v66_v10  ;;  %v80_v23 = vpack.c.bf16 %v65_v18, %v64_v9  ;;  %v1231_v25 = vld [vmem:[%s1462_s1 + $0x8] sm:$0xff]  ;;  %v1243_v27 = vld [vmem:[%s1462_s1 + $0x18] sm:$0xff]  ;;  %v1249_v28 = vld [vmem:[%s1462_s1 + $0x20] sm:$0xff] }
   0xd   :  { %169 = vmatpush.bf16.msra.mxu0 %v86_v5  ;;  %v1255_v29 = vld [vmem:[%s1462_s1 + $0x28] sm:$0xff]  ;;  %v1261_v30 = vld [vmem:[%s1462_s1 + $0x30] sm:$0xff]  ;;  %v1026_v32 = vld [vmem:[%s1465_s4] sm:$0xff] }
   0xe   :  { %v1027_v31 = vld [vmem:[%s1465_s4 + $0x8] sm:$0xff]  ;;  %v1273_v33 = vld [vmem:[%s1462_s1 + $0x38] sm:$0xff] }
   0xf   :  { %274 = vmatpush.bf16.msra.mxu1 %v1027_v31 }
  0x10   :  { %98 = vrot.lane.b32.xlu2 %v69_v15, %s1099_s28 }
  0x11   :  { %170 = vmatpush.bf16.msra.mxu0 %v85_v11  ;;  %90 = vrot.lane.b32.xlu0 %v65_v18, %s1099_s28 }
  0x12   :  { %94 = vrot.lane.b32.xlu1 %v67_v19, %s1099_s28 }
  0x13   :  { %275 = vmatpush.bf16.msra.mxu1 %v1026_v32 }
  0x15   :  { %171 = vmatpush.bf16.msra.mxu0 %v84_v14 }
  0x18   :  { %104 = vrot.lane.b32.xlu2 %v72_v12, %s1099_s28 }
  0x19   :  { %172 = vmatpush.bf16.msra.mxu0 %v83_v20  ;;  %100 = vrot.lane.b32.xlu0 %v70_v16, %s1099_s28 }
  0x1a   :  { %102 = vrot.lane.b32.xlu1 %v71_v17, %s1099_s28 }
  0x1d   :  { %173 = vmatpush.bf16.msra.mxu0 %v82_v21 }
  0x20   :  { %110 = vrot.lane.b32.xlu2 %v75_v8, %s1099_s28 }
  0x21   :  { %174 = vmatpush.bf16.msra.mxu0 %v81_v22  ;;  %106 = vrot.lane.b32.xlu0 %v73_v13, %s1099_s28 }
  0x22   :  { %108 = vrot.lane.b32.xlu1 %v74_v7, %s1099_s28 }
  0x25   :  { %175 = vmatpush.bf16.msra.mxu0 %v80_v23 }
  0x28   :  { %176 = vmatmul.bf16.vlgmr.msra.gmra.mxu0 %v1220_v24  ;;  %116 = vrot.lane.b32.xlu2 %v78_v0, %s1099_s28 }
  0x29   :  { %112 = vrot.lane.b32.xlu0 %v76_v2, %s1099_s28 }
  0x2a   :  { %114 = vrot.lane.b32.xlu1 %v77_v4, %s1099_s28 }
  0x31   :  { %118 = vrot.lane.b32.xlu0 %v79_v1, %s1099_s28 }
  0x38   :  { %181 = vmatmul.bf16.gmra.mxu0 %v1231_v25 }
  0x48   :  { %186 = vmatmul.bf16.gmra.mxu0 %v1237_v26 }
  0x58   :  { %191 = vmatmul.bf16.gmra.mxu0 %v1243_v27 }
  0x62   :  { %v97_v48 = vpop.permute.xlu2 %96 }
  0x68   :  { %196 = vmatmul.bf16.gmra.mxu0 %v1249_v28 }
  0x6a   :  { %v99_v50 = vpop.permute.xlu2 %98 }
  0x72   :  { %v105_v63 = vpop.permute.xlu2 %104 }
  0x78   :  { %201 = vmatmul.bf16.gmra.mxu0 %v1255_v29 }
  0x7a   :  { %v111_v7 = vpop.permute.xlu2 %110 }
  0x7b   :  { %v89_v34 = vpop.permute.xlu0 %88 }
  0x7c   :  { %v93_v41 = vpop.permute.xlu1 %92 }
  0x82   :  { %v117_v20 = vpop.permute.xlu2 %116 }
  0x83   :  { %v91_v36 = vpop.permute.xlu0 %90 }
  0x84   :  { %v95_v43 = vpop.permute.xlu1 %94 }
  0x88   :  { %206 = vmatmul.bf16.gmra.mxu0 %v1261_v30 }
  0x8b   :  { %v101_v56 = vpop.permute.xlu0 %100 }
  0x8c   :  { %v103_v57 = vpop.permute.xlu1 %102 }
  0x93   :  { %v107_v0 = vpop.permute.xlu0 %106 }
  0x94   :  { %v109_v6 = vpop.permute.xlu1 %108 }
  0x98   :  { %211 = vmatmul.bf16.gmra.mxu0 %v1273_v33 }
  0x9b   :  { %v113_v13 = vpop.permute.xlu0 %112 }
  0x9c   :  { %v115_v14 = vpop.permute.xlu1 %114 }
  0xa3   :  { %v119_v21 = vpop.permute.xlu0 %118 }
  0xa5   :  { %v177_v35 = vpop.f32.mrf.mxu0 }
  0xa6   :  { %v178_v38 = vadd.f32 %v177_v35, %v89_v34  ;;  %v1287_v34 = vld [vmem:[%s1467_s6] ss:$0 sm:$0xff] }
  0xad   :  { %v179_v37 = vpop.f32.mrf.mxu0 }
  0xae   :  { %v180_v39 = vadd.f32 %v179_v37, %v91_v36 }
  0xb0   :  { %v217_v40 = vpack.c.bf16 %v180_v39, %v178_v38 }
  0xb2   :  { %978 = vmatmul.msk.bf16.vlgmr.msra.gmra.mxu1 %vm243_vm0, %v217_v40 }
  0xb5   :  { %v182_v42 = vpop.f32.mrf.mxu0 }
  0xb6   :  { %v183_v45 = vadd.f32 %v182_v42, %v93_v41 }
  0xbd   :  { %v184_v44 = vpop.f32.mrf.mxu0 }
  0xbe   :  { %v185_v46 = vadd.f32 %v184_v44, %v95_v43 }
  0xc0   :  { %v218_v47 = vpack.c.bf16 %v185_v46, %v183_v45 }
  0xc2   :  { %979 = vmatmul.msk.bf16.gmra.mxu1 %vm243_vm0, %v218_v47 }
  0xc5   :  { %v187_v49 = vpop.f32.mrf.mxu0 }
  0xc6   :  { %v188_v52 = vadd.f32 %v187_v49, %v97_v48 }
  0xcd   :  { %v189_v51 = vpop.f32.mrf.mxu0 }
  0xce   :  { %v190_v53 = vadd.f32 %v189_v51, %v99_v50 }
  0xd0   :  { %v219_v54 = vpack.c.bf16 %v190_v53, %v188_v52 }
  0xd2   :  { %980 = vmatmul.msk.bf16.gmra.mxu1 %vm243_vm0, %v219_v54 }
  0xd5   :  { %v192_v55 = vpop.f32.mrf.mxu0 }
  0xd6   :  { %v193_v59 = vadd.f32 %v192_v55, %v101_v56 }
  0xdd   :  { %v194_v58 = vpop.f32.mrf.mxu0 }
  0xde   :  { %v195_v60 = vadd.f32 %v194_v58, %v103_v57 }
  0xe0   :  { %v220_v61 = vpack.c.bf16 %v195_v60, %v193_v59 }
  0xe2   :  { %981 = vmatmul.msk.bf16.gmra.mxu1 %vm243_vm0, %v220_v61 }
  0xe5   :  { %v197_v62 = vpop.f32.mrf.mxu0 }
  0xe6   :  { %v198_v2 = vadd.f32 %v197_v62, %v105_v63 }
  0xed   :  { %v199_v1 = vpop.f32.mrf.mxu0 }
  0xee   :  { %v200_v3 = vadd.f32 %v199_v1, %v107_v0 }
  0xf0   :  { %v221_v4 = vpack.c.bf16 %v200_v3, %v198_v2 }
  0xf2   :  { %982 = vmatmul.msk.bf16.gmra.mxu1 %vm243_vm0, %v221_v4 }
  0xf5   :  { %v202_v5 = vpop.f32.mrf.mxu0 }
  0xf6   :  { %v203_v9 = vadd.f32 %v202_v5, %v109_v6 }
  0xfd   :  { %v204_v8 = vpop.f32.mrf.mxu0 }
  0xfe   :  { %v205_v10 = vadd.f32 %v204_v8, %v111_v7 }
 0x100   :  { %v222_v11 = vpack.c.bf16 %v205_v10, %v203_v9 }
 0x102   :  { %983 = vmatmul.msk.bf16.gmra.mxu1 %vm243_vm0, %v222_v11 }
 0x105   :  { %v207_v12 = vpop.f32.mrf.mxu0 }
 0x106   :  { %v208_v16 = vadd.f32 %v207_v12, %v113_v13 }
 0x10d   :  { %v209_v15 = vpop.f32.mrf.mxu0 }
 0x10e   :  { %v210_v17 = vadd.f32 %v209_v15, %v115_v14 }
 0x110   :  { %v223_v18 = vpack.c.bf16 %v210_v17, %v208_v16 }
 0x112   :  { %984 = vmatmul.msk.bf16.gmra.mxu1 %vm243_vm0, %v223_v18 }
 0x115   :  { %v212_v19 = vpop.f32.mrf.mxu0 }
 0x116   :  { %v213_v23 = vadd.f32 %v212_v19, %v117_v20 }
 0x11d   :  { %v214_v22 = vpop.f32.mrf.mxu0 }
 0x11e   :  { %v215_v31 = vadd.f32 %v214_v22, %v119_v21 }
 0x120   :  { %v224_v32 = vpack.c.bf16 %v215_v31, %v213_v23 }
 0x122   :  { %985 = vmatmul.msk.bf16.gmra.mxu1 %vm243_vm0, %v224_v32 }
 0x12f   :  { %v277_v35 = vpop.f32.mrf.mxu1 }
 0x130   :  { %v278_v36 = vadd.f32 %v1287_v34, %v277_v35 }
 0x132   :  { %v317_v37 = vmax.f32 %v278_v36, 0.0 }
 0x134   :  { %341 = vrot.lane.b32.xlu1 %v317_v37, %s1100_s21 }
 0x137   :  { %v279_v38 = vpop.f32.mrf.mxu1 }
 0x138   :  { %v280_v39 = vadd.f32 %v1287_v34, %v279_v38 }
 0x13a   :  { %v318_v40 = vmax.f32 %v280_v39, 0.0 }
 0x13c   :  { %343 = vrot.lane.b32.xlu2 %v318_v40, %s1100_s21  ;;  %v1293_v41 = vpack.c.bf16 %v318_v40, %v317_v37 }
 0x13f   :  { %v282_v42 = vpop.f32.mrf.mxu1 }
 0x140   :  { %v283_v43 = vadd.f32 %v1287_v34, %v282_v42 }
 0x142   :  { %v319_v44 = vmax.f32 %v283_v43, 0.0 }
 0x144   :  { %345 = vrot.lane.b32.xlu0 %v319_v44, %s1100_s21 }
 0x147   :  { %v284_v45 = vpop.f32.mrf.mxu1 }
 0x148   :  { %v285_v46 = vadd.f32 %v1287_v34, %v284_v45 }
 0x14a   :  { %v320_v47 = vmax.f32 %v285_v46, 0.0 }
 0x14c   :  { %347 = vrot.lane.b32.xlu1 %v320_v47, %s1100_s21  ;;  %v334_v48 = vpack.c.bf16 %v320_v47, %v319_v44 }
 0x14f   :  { %v287_v49 = vpop.f32.mrf.mxu1 }
 0x150   :  { %v288_v50 = vadd.f32 %v1287_v34, %v287_v49 }
 0x152   :  { %v321_v51 = vmax.f32 %v288_v50, 0.0 }
 0x154   :  { %349 = vrot.lane.b32.xlu2 %v321_v51, %s1100_s21 }
 0x157   :  { %v289_v52 = vpop.f32.mrf.mxu1 }
 0x158   :  { %v290_v53 = vadd.f32 %v1287_v34, %v289_v52 }
 0x15a   :  { %v322_v54 = vmax.f32 %v290_v53, 0.0 }
 0x15c   :  { %351 = vrot.lane.b32.xlu0 %v322_v54, %s1100_s21  ;;  %v335_v55 = vpack.c.bf16 %v322_v54, %v321_v51 }
 0x15f   :  { %v292_v56 = vpop.f32.mrf.mxu1 }
 0x160   :  { %v293_v57 = vadd.f32 %v1287_v34, %v292_v56 }
 0x162   :  { %v323_v58 = vmax.f32 %v293_v57, 0.0 }
 0x164   :  { %353 = vrot.lane.b32.xlu1 %v323_v58, %s1100_s21 }
 0x167   :  { %v294_v59 = vpop.f32.mrf.mxu1 }
 0x168   :  { %v295_v60 = vadd.f32 %v1287_v34, %v294_v59 }
 0x16a   :  { %v324_v61 = vmax.f32 %v295_v60, 0.0 }
 0x16c   :  { %355 = vrot.lane.b32.xlu2 %v324_v61, %s1100_s21  ;;  %v336_v62 = vpack.c.bf16 %v324_v61, %v323_v58 }
 0x16f   :  { %v297_v63 = vpop.f32.mrf.mxu1 }
 0x170   :  { %v298_v0 = vadd.f32 %v1287_v34, %v297_v63 }
 0x172   :  { %v325_v1 = vmax.f32 %v298_v0, 0.0 }
 0x174   :  { %357 = vrot.lane.b32.xlu0 %v325_v1, %s1100_s21 }
 0x177   :  { %v299_v2 = vpop.f32.mrf.mxu1 }
 0x178   :  { %v300_v3 = vadd.f32 %v1287_v34, %v299_v2 }
 0x17a   :  { %v326_v4 = vmax.f32 %v300_v3, 0.0 }
 0x17c   :  { %359 = vrot.lane.b32.xlu1 %v326_v4, %s1100_s21  ;;  %v337_v35 = vpack.c.bf16 %v326_v4, %v325_v1 }
 0x17f   :  { %v302_v5 = vpop.f32.mrf.mxu1 }
 0x180   :  { %v303_v6 = vadd.f32 %v1287_v34, %v302_v5 }
 0x182   :  { %v327_v7 = vmax.f32 %v303_v6, 0.0 }
 0x184   :  { %361 = vrot.lane.b32.xlu2 %v327_v7, %s1100_s21 }
 0x187   :  { %v304_v8 = vpop.f32.mrf.mxu1 }
 0x188   :  { %v305_v9 = vadd.f32 %v1287_v34, %v304_v8 }
 0x18a   :  { %v328_v10 = vmax.f32 %v305_v9, 0.0 }
 0x18c   :  { %363 = vrot.lane.b32.xlu0 %v328_v10, %s1100_s21  ;;  %v338_v32 = vpack.c.bf16 %v328_v10, %v327_v7 }
 0x18f   :  { %v307_v11 = vpop.f32.mrf.mxu1 }
 0x190   :  { %v308_v12 = vadd.f32 %v1287_v34, %v307_v11 }
 0x192   :  { %v329_v13 = vmax.f32 %v308_v12, 0.0 }
 0x194   :  { %365 = vrot.lane.b32.xlu1 %v329_v13, %s1100_s21 }
 0x197   :  { %v309_v14 = vpop.f32.mrf.mxu1 }
 0x198   :  { %v310_v15 = vadd.f32 %v1287_v34, %v309_v14 }
 0x19a   :  { %v330_v16 = vmax.f32 %v310_v15, 0.0 }
 0x19c   :  { %367 = vrot.lane.b32.xlu2 %v330_v16, %s1100_s21  ;;  %v339_v31 = vpack.c.bf16 %v330_v16, %v329_v13 }
 0x19f   :  { %v312_v17 = vpop.f32.mrf.mxu1 }
 0x1a0   :  { %v313_v18 = vadd.f32 %v1287_v34, %v312_v17 }
 0x1a2   :  { %v331_v19 = vmax.f32 %v313_v18, 0.0 }
 0x1a4   :  { %369 = vrot.lane.b32.xlu0 %v331_v19, %s1100_s21 }
 0x1a7   :  { %v314_v20 = vpop.f32.mrf.mxu1 }
 0x1a8   :  { %v315_v21 = vadd.f32 %v1287_v34, %v314_v20  ;;  %v1029_v34 = vld [vmem:[%s1465_s4 + $0x18] sm:$0xff] }
 0x1a9   :  { %479 = vmatpush.bf16.msra.mxu3 %v1029_v34 }
 0x1aa   :  { %v332_v22 = vmax.f32 %v315_v21, 0.0 }
 0x1ac   :  { %371 = vrot.lane.b32.xlu1 %v332_v22, %s1100_s21  ;;  %v340_v23 = vpack.c.bf16 %v332_v22, %v331_v19  ;;  %v1038_v22 = vld [vmem:[%s1467_s6 + $0x1] ss:$0 sm:$0xff] }
 0x1ae   :  { %373 = vmatpush.bf16.msra.mxu2 %v340_v23 }
 0x1b2   :  { %374 = vmatpush.bf16.msra.mxu2 %v339_v31 }
 0x1b6   :  { %375 = vmatpush.bf16.msra.mxu2 %v338_v32  ;;  %v346_v38 = vpop.permute.xlu0 %345 }
 0x1ba   :  { %376 = vmatpush.bf16.msra.mxu2 %v337_v35 }
 0x1be   :  { %377 = vmatpush.bf16.msra.mxu2 %v336_v62 }
 0x1c2   :  { %378 = vmatpush.bf16.msra.mxu2 %v335_v55 }
 0x1c6   :  { %379 = vmatpush.bf16.msra.mxu2 %v334_v48 }
 0x1ca   :  { %380 = vmatpush.bf16.msra.mxu2 %v1293_v41 }
 0x1cd   :  { %381 = vmatmul.bf16.vlgmr.msra.gmra.mxu2 %v1220_v24  ;;  %v1028_v24 = vld [vmem:[%s1465_s4 + $0x10] sm:$0xff]  ;;  %s935_s4 = sld [smem:[#allocation2 + $0x1]] }
 0x1ce   :  { %480 = vmatpush.bf16.msra.mxu3 %v1028_v24  ;;  %v352_v45 = vpop.permute.xlu0 %351 }
 0x1dd   :  { %386 = vmatmul.bf16.gmra.mxu2 %v1231_v25 }
 0x1e6   :  { %v358_v58 = vpop.permute.xlu0 %357 }
 0x1ed   :  { %391 = vmatmul.bf16.gmra.mxu2 %v1237_v26  ;;  %v344_v26 = vpop.permute.xlu2 %343 }
 0x1fd   :  { %396 = vmatmul.bf16.gmra.mxu2 %v1243_v27  ;;  %v342_v27 = vpop.permute.xlu1 %341 }
 0x1fe   :  { %v364_v2 = vpop.permute.xlu0 %363 }
 0x205   :  { %v348_v39 = vpop.permute.xlu1 %347 }
 0x20d   :  { %401 = vmatmul.bf16.gmra.mxu2 %v1249_v28  ;;  %v354_v52 = vpop.permute.xlu1 %353 }
 0x215   :  { %v360_v59 = vpop.permute.xlu1 %359 }
 0x216   :  { %v370_v15 = vpop.permute.xlu0 %369 }
 0x21d   :  { %406 = vmatmul.bf16.gmra.mxu2 %v1255_v29  ;;  %v366_v9 = vpop.permute.xlu1 %365 }
 0x225   :  { %v372_v16 = vpop.permute.xlu1 %371 }
 0x22d   :  { %411 = vmatmul.bf16.gmra.mxu2 %v1261_v30 }
 0x23d   :  { %416 = vmatmul.bf16.gmra.mxu2 %v1273_v33  ;;  %v350_v33 = vpop.permute.xlu2 %349 }
 0x245   :  { %v356_v51 = vpop.permute.xlu2 %355 }
 0x24d   :  { %v362_v1 = vpop.permute.xlu2 %361 }
 0x250   :  { %v382_v25 = vpop.f32.mrf.mxu2 }
 0x251   :  { %v383_v36 = vadd.f32 %v382_v25, %v342_v27 }
 0x255   :  { %v368_v8 = vpop.permute.xlu2 %367 }
 0x258   :  { %v384_v28 = vpop.f32.mrf.mxu2 }
 0x259   :  { %v385_v29 = vadd.f32 %v384_v28, %v344_v26 }
 0x25b   :  { %v422_v37 = vpack.c.bf16 %v385_v29, %v383_v36 }
 0x25d   :  { %998 = vmatmul.msk.bf16.vlgmr.msra.gmra.mxu3 %vm243_vm0, %v422_v37 }
 0x260   :  { %v387_v30 = vpop.f32.mrf.mxu2 }
 0x261   :  { %v388_v41 = vadd.f32 %v387_v30, %v346_v38 }
 0x268   :  { %v389_v40 = vpop.f32.mrf.mxu2 }
 0x269   :  { %v390_v42 = vadd.f32 %v389_v40, %v348_v39 }
 0x26b   :  { %v423_v43 = vpack.c.bf16 %v390_v42, %v388_v41 }
 0x26d   :  { %999 = vmatmul.msk.bf16.gmra.mxu3 %vm243_vm0, %v423_v43 }
 0x270   :  { %v392_v44 = vpop.f32.mrf.mxu2 }
 0x271   :  { %v393_v47 = vadd.f32 %v392_v44, %v350_v33 }
 0x278   :  { %v394_v46 = vpop.f32.mrf.mxu2 }
 0x279   :  { %v395_v48 = vadd.f32 %v394_v46, %v352_v45 }
 0x27b   :  { %v424_v49 = vpack.c.bf16 %v395_v48, %v393_v47 }
 0x27d   :  { %1000 = vmatmul.msk.bf16.gmra.mxu3 %vm243_vm0, %v424_v49 }
 0x280   :  { %v397_v50 = vpop.f32.mrf.mxu2 }
 0x281   :  { %v398_v54 = vadd.f32 %v397_v50, %v354_v52 }
 0x288   :  { %v399_v53 = vpop.f32.mrf.mxu2 }
 0x289   :  { %v400_v55 = vadd.f32 %v399_v53, %v356_v51 }
 0x28b   :  { %v425_v56 = vpack.c.bf16 %v400_v55, %v398_v54 }
 0x28d   :  { %1001 = vmatmul.msk.bf16.gmra.mxu3 %vm243_vm0, %v425_v56 }
 0x290   :  { %v402_v57 = vpop.f32.mrf.mxu2 }
 0x291   :  { %v403_v61 = vadd.f32 %v402_v57, %v358_v58 }
 0x298   :  { %v404_v60 = vpop.f32.mrf.mxu2 }
 0x299   :  { %v405_v62 = vadd.f32 %v404_v60, %v360_v59 }
 0x29b   :  { %v426_v63 = vpack.c.bf16 %v405_v62, %v403_v61 }
 0x29d   :  { %1002 = vmatmul.msk.bf16.gmra.mxu3 %vm243_vm0, %v426_v63 }
 0x2a0   :  { %v407_v0 = vpop.f32.mrf.mxu2 }
 0x2a1   :  { %v408_v4 = vadd.f32 %v407_v0, %v362_v1 }
 0x2a8   :  { %v409_v3 = vpop.f32.mrf.mxu2 }
 0x2a9   :  { %v410_v5 = vadd.f32 %v409_v3, %v364_v2  ;;  %v563_v3 = vld [vmem:[%s1466_s5 + $0x18] sm:$0xff] }
 0x2aa   :  { %581 = vmatpush.msrb.mxu3 %v563_v3  ;;  %v683_v3 = vstv %s44_s24 }
 0x2ab   :  { %v427_v6 = vpack.c.bf16 %v410_v5, %v408_v4  ;;  %v562_v4 = vld [vmem:[%s1466_s5 + $0x10] sm:$0xff] }
 0x2ac   :  { %582 = vmatpush.msrb.mxu3 %v562_v4 }
 0x2ad   :  { %1003 = vmatmul.msk.bf16.gmra.mxu3 %vm243_vm0, %v427_v6 }
 0x2b0   :  { %v412_v7 = vpop.f32.mrf.mxu2 }
 0x2b1   :  { %v413_v11 = vadd.f32 %v412_v7, %v366_v9  ;;  %v561_v7 = vld [vmem:[%s1466_s5 + $0x8] sm:$0xff] }
 0x2b2   :  { %583 = vmatpush.msrb.mxu3 %v561_v7 }
 0x2b8   :  { %v414_v10 = vpop.f32.mrf.mxu2 }
 0x2b9   :  { %v415_v12 = vadd.f32 %v414_v10, %v368_v8 }
 0x2bb   :  { %v428_v13 = vpack.c.bf16 %v415_v12, %v413_v11 }
 0x2bd   :  { %1004 = vmatmul.msk.bf16.gmra.mxu3 %vm243_vm0, %v428_v13 }
 0x2c0   :  { %v417_v14 = vpop.f32.mrf.mxu2 }
 0x2c1   :  { %v418_v18 = vadd.f32 %v417_v14, %v370_v15 }
 0x2c8   :  { %v419_v17 = vpop.f32.mrf.mxu2 }
 0x2c9   :  { %v420_v19 = vadd.f32 %v419_v17, %v372_v16  ;;  %v538_v17 = vld [vmem:[%s1464_s3] sm:$0xf] }
 0x2cb   :  { %v429_v20 = vpack.c.bf16 %v420_v19, %v418_v18  ;;  %v560_v18 = vld [vmem:[%s1466_s5] sm:$0xff]  ;;  %v593_v19 = vld [vmem:[%s1466_s5 + $0x38] sm:$0xff] }
 0x2cc   :  { %584 = vmatpush.msrb.mxu3 %v560_v18 }
 0x2cd   :  { %1005 = vmatmul.msk.bf16.gmra.mxu3 %vm243_vm0, %v429_v20 }
 0x2ce   :  { %611 = vmatpush.msra.mxu3 %v593_v19 }
 0x2e0   :  { %v482_v21 = vpop.f32.mrf.mxu3 }
 0x2e1   :  { %v483_v23 = vadd.f32 %v1038_v22, %v482_v21 }
 0x2e3   :  { %v522_v35 = vmax.f32 %v483_v23, 0.0  ;;  %v591_v23 = vld [vmem:[%s1466_s5 + $0x28] sm:$0xff] }
 0x2e8   :  { %v484_v31 = vpop.f32.mrf.mxu3 }
 0x2e9   :  { %v485_v32 = vadd.f32 %v1038_v22, %v484_v31  ;;  %v590_v31 = vld [vmem:[%s1466_s5 + $0x20] sm:$0xff] }
 0x2eb   :  { %v523_v34 = vmax.f32 %v485_v32, 0.0  ;;  %v1039_v32 = vld [vmem:[%s1467_s6 + $0x2] ss:$0 sm:$0xff] }
 0x2ed   :  { %v539_v24 = vpack.c.bf16 %v523_v34, %v522_v35 }
 0x2f0   :  { %v487_v25 = vpop.f32.mrf.mxu3 }
 0x2f1   :  { %v488_v26 = vadd.f32 %v1038_v22, %v487_v25  ;;  %v620_v25 = vlaneseq }
 0x2f3   :  { %v524_v36 = vmax.f32 %v488_v26, 0.0  ;;  %v1381_v26 = vand.u32 127, %v620_v25 }
 0x2f5   :  { %vm622_vm1 = vcmp.lt.s32.totalorder %v1381_v26, 32 }
 0x2f8   :  { %v489_v27 = vpop.f32.mrf.mxu3 }
 0x2f9   :  { %v490_v28 = vadd.f32 %v1038_v22, %v489_v27 }
 0x2fb   :  { %v525_v29 = vmax.f32 %v490_v28, 0.0  ;;  %v1040_v28 = vld [vmem:[%s1467_s6 + $0x3] ss:$0 sm:$0xff] }
 0x2fd   :  { %v540_v37 = vpack.c.bf16 %v525_v29, %v524_v36 }
 0x300   :  { %v492_v30 = vpop.f32.mrf.mxu3 }
 0x301   :  { %v493_v38 = vadd.f32 %v1038_v22, %v492_v30 }
 0x303   :  { %v526_v41 = vmax.f32 %v493_v38, 0.0  ;;  %v1387_v38 = vshrl.u32 %v620_v25, 7  ;;  %v766_v25 = vld [vmem:[%s1466_s5 + $0x70] sm:$0xff] }
 0x305   :  { %vm628_vm2 = vcmp.eq.s32.totalorder %v1387_v38, %v1381_v26 }
 0x308   :  { %v494_v39 = vpop.f32.mrf.mxu3 }
 0x309   :  { %v495_v40 = vadd.f32 %v1038_v22, %v494_v39  ;;  %v1102_v39 = vmov 0.0  }
 0x30b   :  { %v527_v42 = vmax.f32 %v495_v40, 0.0  ;;  %v1008_v40 = vsel %vm628_vm2, 1.0, %v1102_v39 }
 0x30d   :  { %v541_v43 = vpack.c.bf16 %v527_v42, %v526_v41 }
 0x310   :  { %v497_v44 = vpop.f32.mrf.mxu3 }
 0x311   :  { %v498_v33 = vadd.f32 %v1038_v22, %v497_v44 }
 0x313   :  { %v528_v47 = vmax.f32 %v498_v33, 0.0 }
 0x318   :  { %v499_v45 = vpop.f32.mrf.mxu3 }
 0x319   :  { %v500_v46 = vadd.f32 %v1038_v22, %v499_v45 }
 0x31b   :  { %v529_v48 = vmax.f32 %v500_v46, 0.0 }
 0x31d   :  { %v542_v49 = vpack.c.bf16 %v529_v48, %v528_v47 }
 0x320   :  { %v502_v50 = vpop.f32.mrf.mxu3 }
 0x321   :  { %v503_v11 = vadd.f32 %v1038_v22, %v502_v50 }
 0x323   :  { %v530_v15 = vmax.f32 %v503_v11, 0.0 }
 0x328   :  { %v504_v51 = vpop.f32.mrf.mxu3 }
 0x329   :  { %v505_v8 = vadd.f32 %v1038_v22, %v504_v51 }
 0x32b   :  { %v531_v13 = vmax.f32 %v505_v8, 0.0 }
 0x32d   :  { %v543_v16 = vpack.c.bf16 %v531_v13, %v530_v15 }
 0x330   :  { %v507_v52 = vpop.f32.mrf.mxu3 }
 0x331   :  { %v508_v5 = vadd.f32 %v1038_v22, %v507_v52 }
 0x333   :  { %v532_v12 = vmax.f32 %v508_v5, 0.0  ;;  %v685_v5 = vstv %s935_s4 }
 0x338   :  { %v509_v53 = vpop.f32.mrf.mxu3 }
 0x339   :  { %v510_v0 = vadd.f32 %v1038_v22, %v509_v53 }
 0x33b   :  { %v533_v9 = vmax.f32 %v510_v0, 0.0  ;;  %v681_v0 = vsub.f32 1.0, %v1008_v40 }
 0x33d   :  { %v544_v14 = vpack.c.bf16 %v533_v9, %v532_v12 }
 0x340   :  { %v512_v54 = vpop.f32.mrf.mxu3 }
 0x341   :  { %v513_v61 = vadd.f32 %v1038_v22, %v512_v54 }
 0x343   :  { %v534_v6 = vmax.f32 %v513_v61, 0.0 }
 0x348   :  { %v514_v55 = vpop.f32.mrf.mxu3 }
 0x349   :  { %v515_v59 = vadd.f32 %v1038_v22, %v514_v55 }
 0x34b   :  { %v535_v1 = vmax.f32 %v515_v59, 0.0 }
 0x34d   :  { %v545_v10 = vpack.c.bf16 %v535_v1, %v534_v6 }
 0x350   :  { %v517_v56 = vpop.f32.mrf.mxu3 }
 0x351   :  { %v518_v57 = vadd.f32 %v1038_v22, %v517_v56 }
 0x353   :  { %v536_v62 = vmax.f32 %v518_v57, 0.0 }
 0x358   :  { %v519_v58 = vpop.f32.mrf.mxu3 }
 0x359   :  { %v520_v60 = vadd.f32 %v1038_v22, %v519_v58  ;;  %v592_v22 = vld [vmem:[%s1466_s5 + $0x30] sm:$0xff] }
 0x35a   :  { %612 = vmatpush.msra.mxu3 %v592_v22 }
 0x35b   :  { %v537_v63 = vmax.f32 %v520_v60, 0.0 }
 0x35c   :  { %613 = vmatpush.msra.mxu3 %v591_v23 }
 0x35d   :  { %v546_v2 = vpack.c.bf16 %v537_v63, %v536_v62 }
 0x35e   :  { %614 = vmatpush.msra.mxu3 %v590_v31 }
 0x35f   :  { %547 = vmatpush.bf16.msrb.mxu1 %v546_v2 }
 0x363   :  { %548 = vmatpush.bf16.msrb.mxu1 %v545_v10 }
 0x367   :  { %549 = vmatpush.bf16.msrb.mxu1 %v544_v14 }
 0x36b   :  { %550 = vmatpush.bf16.msrb.mxu1 %v543_v16 }
 0x36f   :  { %551 = vmatpush.bf16.msrb.mxu1 %v542_v49 }
 0x373   :  { %552 = vmatpush.bf16.msrb.mxu1 %v541_v43 }
 0x377   :  { %553 = vmatpush.bf16.msrb.mxu1 %v540_v37 }
 0x37b   :  { %554 = vmatpush.bf16.msrb.mxu1 %v539_v24 }
 0x37e   :  { %555 = vmatmul.bf16.vlgmr.msrb.gmra.mxu1 %v538_v17 }
 0x3fb   :  { %v556_v20 = vpop.f32.mrf.mxu1 }
 0x3fc   :  { %1006 = vmatmul.msk.f32.vlgmr.msrb.gmra.mxu3 %vm243_vm0, %v556_v20 }
 0x403   :  { %v558_v21 = vpop.f32.mrf.mxu1 }
 0x47f   :  { %v586_v35 = vpop.f32.mrf.mxu3 }
 0x480   :  { %v587_v34 = vadd.f32 %v1039_v32, %v586_v35 }
 0x482   :  { %v589_v24 = vmax.f32 %v587_v34, 0.0  ;;  %623 = vrot.lane.b32.xlu0 %v587_v34, %s1101_s22 }
 0x484   :  { %1007 = vmatmul.msk.f32.vlgmr.msra.gmra.mxu3 %vm243_vm0, %v589_v24  ;;  %v767_v24 = vld [vmem:[%s1466_s5 + $0x78] sm:$0xff] }
 0x485   :  { %782 = vmatpush.msrb.mxu2 %v767_v24 }
 0x487   :  { %783 = vmatpush.msrb.mxu2 %v766_v25 }
 0x4f4   :  { %v624_v27 = vpop.permute.xlu0 %623 }
 0x4f5   :  { %1010 = vmatpush.msk.msrb.mxu3 %vm622_vm1, %v624_v27  ;;  %v765_v27 = vld [vmem:[%s1466_s5 + $0x68] sm:$0xff] }
 0x4f6   :  { %784 = vmatpush.msrb.mxu2 %v765_v27 }
 0x507   :  { %v616_v36 = vpop.f32.mrf.mxu3 }
 0x508   :  { %v617_v29 = vadd.f32 %v1040_v28, %v616_v36  ;;  %v764_v28 = vld [vmem:[%s1466_s5 + $0x60] sm:$0xff]  ;;  %v763_v36 = vld [vmem:[%s1466_s5 + $0x58] sm:$0xff] }
 0x509   :  { %785 = vmatpush.msrb.mxu2 %v764_v28 }
 0x50a   :  { %v619_v37 = vmax.f32 %v617_v29, 0.0  ;;  %v762_v29 = vld [vmem:[%s1466_s5 + $0x50] sm:$0xff] }
 0x50b   :  { %786 = vmatpush.msrb.mxu2 %v763_v36  ;;  %v1043_v36 = vld [vmem:[%s1467_s6 + $0x6] ss:$0 sm:$0xff] }
 0x50c   :  { %646 = vmatpush.xpose.msra.mxu1 %v619_v37  ;;  %v651_v30 = vmul.f32 %v619_v37, %v619_v37 }
 0x50d   :  { %787 = vmatpush.msrb.mxu2 %v762_v29 }
 0x50e   :  { %652 = vadd.xlane.f32.xlu2 %v651_v30  ;;  %v760_v30 = vld [vmem:[%s1466_s5 + $0x40] sm:$0xff] }
 0x50f   :  { %647 = vmatmul.f32.vlgmr.msra.gmra.mxu1 %v619_v37  ;;  %v761_v37 = vld [vmem:[%s1466_s5 + $0x48] sm:$0xff] }
 0x510   :  { %788 = vmatpush.msrb.mxu2 %v761_v37 }
 0x512   :  { %789 = vmatpush.msrb.mxu2 %v760_v30 }
 0x581   :  { %v653_v49 = vpop.xlane.xlu2 %652 }
 0x58c   :  { %v648_v41 = vpop.f32.mrf.mxu1 }
 0x58d   :  { %v654_v42 = vmul.f32 %v1008_v40, %v648_v41  ;;  %v664_v51 = vmul.f32 2.0, %v648_v41 }
 0x58f   :  { %v656_v43 = vsel %vm655_vm3, %v654_v42, 0.0 }
 0x590   :  { %v657_v44 = vrot.slane %v656_v43, 4 }
 0x592   :  { %v658_v33 = vadd.f32 %v657_v44, %v656_v43 }
 0x594   :  { %v659_v45 = vrot.slane %v658_v33, 2 }
 0x596   :  { %v660_v46 = vadd.f32 %v659_v45, %v658_v33  ;;  %v797_v33 = vld [vmem:[%s1466_s5 + $0x90] sm:$0xff]  ;;  %v796_v45 = vld [vmem:[%s1466_s5 + $0x88] sm:$0xff] }
 0x598   :  { %v661_v47 = vrot.slane %v660_v46, 1 }
 0x59a   :  { %v662_v48 = vadd.f32 %v661_v47, %v660_v46  ;;  %v795_v46 = vld [vmem:[%s1466_s5 + $0x80] sm:$0xff] }
 0x59b   :  { %v1041_v47 = vld [vmem:[%s1467_s6 + $0x4] ss:$0 sm:$0xff] }
 0x59c   :  { %v663_v50 = vadd.f32 %v662_v48, %v653_v49 }
 0x59e   :  { %v665_v52 = vsub.f32 %v663_v50, %v664_v51  ;;  %v826_v51 = vld [vmem:[%s1466_s5 + $0xa8] sm:$0xff] }
 0x59f   :  { %847 = vmatpush.msra.mxu3 %v826_v51 }
 0x5a0   :  { %v666_v53 = vmax.f32 %v665_v52, 0.0  ;;  %v825_v52 = vld [vmem:[%s1466_s5 + $0xa0] sm:$0xff] }
 0x5a1   :  { %848 = vmatpush.msra.mxu3 %v825_v52 }
 0x5a2   :  { %v667_v54 = vadd.f32 1.1920929e-07, %v666_v53  ;;  %v1042_v53 = vld [vmem:[%s1467_s6 + $0x5] ss:$0 sm:$0xff] }
 0x5a4   :  { %1044 = vrsqrt.f32 %v667_v54  ;;  %vm675_vm4 = vcmp.eq.f32.partialorder %v667_v54, inf  ;;  %v678_v62 = vand.u32 2147483648, %v667_v54  ;;  %vm677_vm5 = vcmp.eq.f32.partialorder %v667_v54, 0.0 }
 0x5aa   :  { %v1045_v55 = vpop.eup %1044 }
 0x5ab   :  { %v669_v56 = vmul.f32 %v1045_v55, %v667_v54 }
 0x5ad   :  { %v670_v57 = vmul.f32 %v1045_v55, %v669_v56 }
 0x5af   :  { %v671_v58 = vmul.f32 0.5, %v670_v57 }
 0x5b1   :  { %v672_v59 = vsub.f32 1.5, %v671_v58 }
 0x5b3   :  { %v673_v60 = vmul.f32 %v1045_v55, %v672_v59  ;;  %v853_v59 = vcvt.s32.f32 %v1387_v38 }
 0x5b5   :  { %v674_v61 = vmul.f32 %v673_v60, %v667_v54 }
 0x5b7   :  { %v676_v63 = vsel %vm675_vm4, %v667_v54, %v674_v61  ;;  %v1016_v61 = vadd.f32 -4.0, %v853_v59 }
 0x5b8   :  { %v679_v1 = vsel %vm677_vm5, %v678_v62, %v676_v63  ;;  %v855_v62 = vstv %s936_s17  ;;  %vm904_vm5 = vcmp.eq.s32.totalorder %v1381_v26, 1 }
 0x5b9   :  { %v680_v2 = vsub.f32 0.0, %v679_v1  ;;  %v1017_v28 = vsel %vm904_vm5, 1.0, %v1102_v39 }
 0x5bb   :  { %v682_v4 = vmul.f32 %v681_v0, %v680_v2  ;;  %v856_v0 = vsub.f32 %v855_v62, %v1016_v61 }
 0x5bd   :  { %v684_v6 = vmul.f32 %v683_v3, %v682_v4  ;;  %v857_v2 = vadd.f32 1.0, %v856_v0 }
 0x5bf   :  { %v686_v7 = vadd.f32 %v685_v5, %v684_v6  ;;  %v858_v6 = vmul.f32 %v857_v2, %v857_v2 }
 0x5c1   :  { %v687_v8 = vadd.f32 %v1008_v40, %v686_v7  ;;  %v798_v40 = vld [vmem:[%s1466_s5 + $0x98] sm:$0xff]  ;;  %s937_s5 = sld [smem:[#allocation2 + $0x3]] }
 0x5c2   :  { %816 = vmatpush.msrb.mxu1 %v798_v40 }
 0x5c3   :  { %v1009_v9 = vmul.f32 -1.442695, %v687_v8 }
 0x5c4   :  { %817 = vmatpush.msrb.mxu1 %v797_v33 }
 0x5c5   :  { %1046 = vpow2.f32 %v1009_v9  ;;  %v859_v9 = vsub.f32 0.0, %v858_v6 }
 0x5c6   :  { %818 = vmatpush.msrb.mxu1 %v796_v45 }
 0x5c7   :  { %s860_s16 = smul.f32 %s937_s5, %s937_s5 }
 0x5c8   :  { %819 = vmatpush.msrb.mxu1 %v795_v46 }
 0x5c9   :  { %v861_v57 = vstv %s860_s16 }
 0x5ca   :  { %vm867_vm12 = vweird.f32 %v861_v57  ;;  %v873_v3 = vand.u32 2147483648, %v861_v57  ;;  %v871_v5 = vand.u32 2147483647, %v861_v57 }
 0x5cb   :  { %v1047_v10 = vpop.eup %1046 }
 0x5cc   :  { %v691_v11 = vadd.f32 1.0, %v1047_v10  ;;  %v874_v7 = vor.u32 1.1754944e-38, %v873_v3  ;;  %vm872_vm15 = vcmp.eq.f32.partialorder %v871_v5, 8.507059e+37 }
 0x5ce   :  { %1048 = vrcp.f32 %v691_v11  ;;  %v703_v15 = vand.u32 2147483648, %v691_v11  ;;  %v701_v17 = vand.u32 2147483647, %v691_v11  ;;  %vm697_vm7 = vweird.f32 %v691_v11 }
 0x5d0   :  { %v704_v19 = vor.u32 1.1754944e-38, %v703_v15  ;;  %vm702_vm9 = vcmp.eq.f32.partialorder %v701_v17, 8.507059e+37 }
 0x5d4   :  { %v1049_v12 = vpop.eup %1048 }
 0x5d5   :  { %v693_v13 = vmul.f32 %v1049_v12, %v691_v11  ;;  %vm698_vm6 = vweird.f32 %v1049_v12 }
 0x5d6   :  { %vm699_vm8 = vmor %vm697_vm7, %vm698_vm6 }
 0x5d7   :  { %v694_v14 = vsub.f32 1.0, %v693_v13 }
 0x5d9   :  { %v695_v16 = vmul.f32 %v1049_v12, %v694_v14 }
 0x5db   :  { %v696_v18 = vadd.f32 %v1049_v12, %v695_v16 }
 0x5dd   :  { %v700_v20 = vsel %vm699_vm8, %v1049_v12, %v696_v18 }
 0x5de   :  { %v705_v21 = vsel %vm702_vm9, %v704_v19, %v700_v20 }
 0x5df   :  { %1011 = vmatmul.msk.f32.vlgmr.msrb.gmra.mxu3 %vm655_vm3, %v705_v21  ;;  %903 = vst.msk [vmem:[%s1469_s8] sm:$0xff] %vm655_vm3, %v705_v21  ;;  %v707_v22 = vsel %vm655_vm3, %v705_v21, 0.0 }
 0x5e0   :  { %708 = vadd.xlane.f32.xlu1 %v707_v22 }
 0x653   :  { %v709_v23 = vpop.xlane.xlu1 %708 }
 0x654   :  { %1050 = vrcp.f32 %v709_v23 }
 0x655   :  { %1052 = vrcp.f32 %v861_v57 }
 0x65a   :  { %v1051_v31 = vpop.eup %1050 }
 0x65b   :  { %v1053_v58 = vpop.eup %1052 }
 0x65c   :  { %v863_v60 = vmul.f32 %v1053_v58, %v861_v57  ;;  %vm868_vm13 = vweird.f32 %v1053_v58 }
 0x65d   :  { %vm869_vm14 = vmor %vm867_vm12, %vm868_vm13 }
 0x65e   :  { %v864_v63 = vsub.f32 1.0, %v863_v60 }
 0x660   :  { %v865_v1 = vmul.f32 %v1053_v58, %v864_v63 }
 0x662   :  { %v731_v32 = vpop.f32.mrf.mxu3  ;;  %v866_v4 = vadd.f32 %v1053_v58, %v865_v1 }
 0x663   :  { %v734_v35 = vmul.f32 %v1051_v31, %v731_v32 }
 0x664   :  { %v870_v8 = vsel %vm869_vm14, %v1053_v58, %v866_v4 }
 0x665   :  { %v735_v34 = vmax.f32 %v734_v35, 0.0  ;;  %v875_v10 = vsel %vm872_vm15, %v874_v7, %v870_v8 }
 0x666   :  { %v876_v38 = vmul.f32 %v875_v10, %v859_v9 }
 0x667   :  { %902 = vst [vmem:[#allocation5] sm:$0xff] %v735_v34  ;;  %757 = vrot.lane.b32.xlu0 %v735_v34, %s1103_s27  ;;  %751 = vmatpush.msrb.mxu0 %v735_v34 }
 0x668   :  { %1012 = vmatmul.msk.f32.vlgmr.msrb.gmra.mxu0 %vm655_vm3, %v705_v21  ;;  %920 = dma.vmem_to_hbm [thread:$0]  %s916_s12, 128, %s918_s15, [#allocation3]   ;;  %v877_v11 = vmul.f32 1.442695, %v876_v38 }
 0x66a   :  { %1054 = vpow2.f32 %v877_v11 }
 0x670   :  { %v1055_v12 = vpop.eup %1054 }
 0x6d9   :  { %v758_v43 = vpop.permute.xlu0 %757 }
 0x6e5   :  { %v753_v41 = vpop.f32.mrf.mxu0 }
 0x6e6   :  { %v756_v42 = vmul.f32 0.125, %v753_v41 }
 0x6e8   :  { %v759_v44 = vadd.f32 %v758_v43, %v756_v42 }
 0x6ea   :  { %1013 = vmatmul.msk.f32.vlgmr.msrb.gmra.mxu2 %vm770_vm10, %v759_v44 }
 0x76d   :  { %v791_v48 = vpop.f32.mrf.mxu2 }
 0x76e   :  { %v792_v49 = vadd.f32 %v1041_v47, %v791_v48 }
 0x770   :  { %v794_v50 = vmax.f32 %v792_v49, 0.0 }
 0x772   :  { %1014 = vmatmul.msk.f32.vlgmr.msrb.gmra.mxu1 %vm243_vm0, %v794_v50  ;;  %vm879_vm0 = vcmp.ge.f32.partialorder %v853_v59, 4.0 }
 0x773   :  { %v880_v13 = vsel %vm879_vm0, %v1055_v12, 0.0 }
 0x774   :  { %v881_v14 = vrot.slane %v880_v13, 4 }
 0x776   :  { %v882_v15 = vadd.f32 %v881_v14, %v880_v13 }
 0x778   :  { %v883_v16 = vrot.slane %v882_v15, 2 }
 0x77a   :  { %v884_v17 = vadd.f32 %v883_v16, %v882_v15 }
 0x77c   :  { %v885_v18 = vrot.slane %v884_v17, 1 }
 0x77e   :  { %v886_v19 = vadd.f32 %v885_v18, %v884_v17 }
 0x780   :  { %1056 = vrcp.f32 %v886_v19  ;;  %vm892_vm1 = vweird.f32 %v886_v19  ;;  %v898_v31 = vand.u32 2147483648, %v886_v19  ;;  %v896_v35 = vand.u32 2147483647, %v886_v19 }
 0x782   :  { %v899_v34 = vor.u32 1.1754944e-38, %v898_v31  ;;  %vm897_vm4 = vcmp.eq.f32.partialorder %v896_v35, 8.507059e+37 }
 0x786   :  { %v1057_v20 = vpop.eup %1056 }
 0x787   :  { %v888_v21 = vmul.f32 %v1057_v20, %v886_v19  ;;  %vm893_vm2 = vweird.f32 %v1057_v20 }
 0x788   :  { %vm894_vm3 = vmor %vm892_vm1, %vm893_vm2 }
 0x789   :  { %v889_v22 = vsub.f32 1.0, %v888_v21 }
 0x78b   :  { %v890_v23 = vmul.f32 %v1057_v20, %v889_v22 }
 0x78d   :  { %v891_v32 = vadd.f32 %v1057_v20, %v890_v23 }
 0x78f   :  { %v895_v24 = vsel %vm894_vm3, %v1057_v20, %v891_v32 }
 0x790   :  { %v900_v25 = vsel %vm897_vm4, %v899_v34, %v895_v24 }
 0x791   :  { %v901_v27 = vmul.f32 %v900_v25, %v880_v13 }
 0x793   :  { %v907_v29 = vmul.f32 %v1017_v28, %v901_v27 }
 0x7ef   :  { %v821_v54 = vpop.f32.mrf.mxu1 }
 0x7f0   :  { %v822_v55 = vadd.f32 %v1042_v53, %v821_v54 }
 0x7f2   :  { %v824_v56 = vmax.f32 %v822_v55, 0.0 }
 0x7f4   :  { %1015 = vmatmul.msk.f32.vlgmr.msra.gmra.mxu3 %vm829_vm11, %v824_v56 }
 0x877   :  { %v850_v37 = vpop.f32.mrf.mxu3 }
 0x878   :  { %v851_v30 = vadd.f32 %v1043_v36, %v850_v37 }
 0x87a   :  { %v908_v40 = vadd.f32 %v907_v29, %v851_v30 }
 0x87c   :  { %909 = vst [vmem:[%s1470_s9] sm:$0xff] %v908_v40 }
 0x87d   :  { %1096 = dma.done.wait [#allocation3], 128  }
 0x87e   :  { %1097 = vsyncadd [#allocation3], 4294967168 }
 0x87f   :  { %933 = vsyncpa [#allocation3], 1 }
 0x880   :  { %934 = vsyncpa [#allocation4], 1 }

</bundles_post_ra>
